<compile_context>
chip_gen: v7x
topology: tpu7x:2x2x1
jax: 0.10.0
libtpu: 0.0.40
codegen_flags: <defaults>
</compile_context>

<pallas_src>
import functools

import jax
import jax.numpy as jnp
from jax.experimental import pallas as pl
from jax.experimental.pallas import tpu as pltpu


def _layer_norm_kernel(x_ref, alpha_ref, bias_ref, o_ref, *, eps, features):
    """One (block_rows, features) tile: row-min centering + unbiased-std scale."""
    x = x_ref[...].astype(jnp.float32)                     # (TR, D) f32
    # TODO(synk): for bf16 inputs on v6e/v7x the elementwise path could stay in
    # bf16 (only the reductions need f32); kept f32 here for v5e portability.

    # Reference quirk (kept on purpose): centering uses the per-row *min*
    # values (x.min(dim=-1) in the PyTorch code), not the mean.
    mn = jnp.min(x, axis=-1, keepdims=True)                # (TR, 1)

    # One-pass moments: sum(x) and sum(x*x) share one sweep through the XLU;
    # no (TR, D) `diff` / `diff*diff` temporaries (less VPU work / vreg use).
    s1 = jnp.sum(x, axis=-1, keepdims=True)                # (TR, 1)
    s2 = jnp.sum(x * x, axis=-1, keepdims=True)            # (TR, 1)
    mu = s1 * (1.0 / features)
    var = (s2 - features * (mu * mu)) / float(features - 1)   # torch unbiased
    var = jnp.maximum(var, 0.0)                            # guard cancellation
    denom = jnp.sqrt(var) + eps                            # std + eps

    # (TR, 1) EUP reciprocal (+1 Newton step -> ~f32 accuracy) replaces a full
    # (TR, D) VPU divide.
    r = pl.reciprocal(denom, approx=True)
    r = r * (2.0 - denom * r)

    y = (x - mn) * r                                       # (TR, D)

    # Reference writes `alpha @ (...)` which is shape-invalid; applied as the
    # usual elementwise per-feature scale.
    o_ref[...] = (alpha_ref[...] * y + bias_ref[...]).astype(o_ref.dtype)


def _choose_block_rows(n_rows, d, itemsize, *, target_tile_bytes=4 << 20,
                       min_grid_steps=8):
    """VMEM-budget-driven, dtype-aligned row tile; >= min_grid_steps when big."""
    # Sublane packing: 8 rows/vreg for 32-bit, 16 for 16-bit, 32 for 8-bit.
    align = {1: 32, 2: 16}.get(itemsize, 8)
    row_bytes = d * itemsize
    br = max(align, (int(target_tile_bytes // row_bytes) // align) * align)
    # Keep >= min_grid_steps steps when the input is large enough so the single
    # "parallel" axis can be split across v7x's two TensorCores.
    if n_rows > min_grid_steps * align:
        cap = max(align, (pl.cdiv(n_rows, min_grid_steps) // align) * align)
        br = min(br, cap)
    if br >= n_rows:
        return n_rows          # single tile == full array (always a legal block)
    return br


def layer_normalization(x, alpha, bias, *, eps=1e-6, block_rows=None):
    """x: (..., features); alpha, bias: (features,). Returns same shape as x."""
    orig_shape = x.shape
    D = orig_shape[-1]
    x2 = x.reshape(-1, D)
    N = x2.shape[0]
    itemsize = jnp.dtype(x.dtype).itemsize

    br = block_rows if block_rows is not None else _choose_block_rows(N, D, itemsize)
    br = min(br, N)
    grid = (pl.cdiv(N, br),)

    # VMEM budget: double-buffered input + output tiles, ~3 full-tile f32
    # temporaries, and the resident alpha/bias.  Clamp to 64 MiB (v7x ceiling).
    est = (2 * br * D * itemsize          # x tiles (double buffered)
           + 2 * br * D * itemsize        # out tiles (double buffered)
           + 3 * br * D * 4               # f32 intermediates inside the kernel
           + 4 * D * 4)                   # alpha / bias (resident)
    vmem_limit = int(min(64 << 20, max(32 << 20, int(est * 1.25))))

    kernel = functools.partial(_layer_norm_kernel, eps=eps, features=D)

    # NOTE: when D is not a multiple of 128 (tiny models), output stores are
    # masked partial-lane stores; real-model D (a multiple of 128) is
    # lane-dense and hits the full-store fast path.
    out = pl.pallas_call(
        kernel,
        out_shape=jax.ShapeDtypeStruct((N, D), x.dtype),
        grid=grid,
        in_specs=[
            pl.BlockSpec((br, D), lambda i: (i, 0)),     # x row tile
            pl.BlockSpec((1, D), lambda i: (0, 0)),      # alpha (VMEM resident)
            pl.BlockSpec((1, D), lambda i: (0, 0)),      # bias  (VMEM resident)
        ],
        out_specs=pl.BlockSpec((br, D), lambda i: (i, 0)),
        compiler_params=pltpu.CompilerParams(
            dimension_semantics=("parallel",),
            vmem_limit_bytes=vmem_limit,
        ),
    )(x2, alpha.reshape(1, D), bias.reshape(1, D))

    return out.reshape(orig_shape)


def _reference(x, alpha, bias, eps=1e-6):
    mn = jnp.min(x, axis=-1, keepdims=True)
    mu = jnp.mean(x, axis=-1, keepdims=True)
    var = jnp.sum((x - mu) ** 2, axis=-1, keepdims=True) / (x.shape[-1] - 1)
    std = jnp.sqrt(var)
    return alpha * (x - mn) / (std + eps) + bias


if __name__ == "__main__":
    key = jax.random.PRNGKey(0)
    kx, ka, kb, kx2 = jax.random.split(key, 4)

    # Test 1: module-sized shapes (batch=2, seq=8, hidden=32).
    B, S, D = 2, 8, 32
    x = jax.random.normal(kx, (B, S, D), dtype=jnp.float32)
    # Parameters are learnable (init ones/zeros); perturb so scale/shift is
    # actually exercised.
    alpha = 1.0 + 0.1 * jax.random.normal(ka, (D,), dtype=jnp.float32)
    bias = 0.1 * jax.random.normal(kb, (D,), dtype=jnp.float32)

    out = jax.block_until_ready(layer_normalization(x, alpha, bias, eps=1e-6))
    ref = _reference(x, alpha, bias, eps=1e-6)
    assert out.shape == x.shape
    # rtol slightly loosened for the EUP approx-reciprocal (+Newton) fast path.
    assert jnp.allclose(out, ref, atol=1e-5, rtol=1e-4), "mismatch (small shape)"

    # Test 2: lane-dense D (multiple of 128) with enough rows to exercise the
    # multi-step row-tiling / pipelining path (grid of 8 x 32-row tiles).
    B2, S2, D2 = 4, 64, 128
    x_big = jax.random.normal(kx2, (B2, S2, D2), dtype=jnp.float32)
    alpha_big = jnp.ones((D2,), dtype=jnp.float32)
    bias_big = jnp.zeros((D2,), dtype=jnp.float32)
    out_big = jax.block_until_ready(
        layer_normalization(x_big, alpha_big, bias_big, eps=1e-6))
    ref_big = _reference(x_big, alpha_big, bias_big, eps=1e-6)
    assert out_big.shape == x_big.shape
    assert jnp.allclose(out_big, ref_big, atol=1e-5, rtol=1e-4), "mismatch (tiled)"

    print("KERNEL_OK")
</pallas_src>

<mosaic_0001>
module attributes {stable_mosaic.version = 11 : i64} {
  func.func @_layer_norm_kernel(%arg0: i32, %arg1: memref<16x32xf32, #tpu.memory_space<vmem>>, %arg2: memref<1x32xf32, #tpu.memory_space<vmem>>, %arg3: memref<1x32xf32, #tpu.memory_space<vmem>>, %arg4: memref<16x32xf32, #tpu.memory_space<vmem>>) attributes {dimension_semantics = [#tpu.dimension_semantics<parallel>], iteration_bounds = array<i64: 1>, scalar_prefetch = 0 : i64, scratch_operands = 0 : i64, tpu.core_type = #tpu.core_type<tc>, window_params = [{transform_indices = @transform_0, window_bounds = array<i64: 16, 32>}, {pipeline_mode = #tpu.pipeline_mode<synchronous>, transform_indices = @transform_1, window_bounds = array<i64: 1, 32>}, {pipeline_mode = #tpu.pipeline_mode<synchronous>, transform_indices = @transform_2, window_bounds = array<i64: 1, 32>}, {transform_indices = @transform_3, window_bounds = array<i64: 16, 32>}]} {
    %c0 = arith.constant 0 : index
    %c0_0 = arith.constant 0 : index
    %0 = vector.load %arg1[%c0, %c0_0] : memref<16x32xf32, #tpu.memory_space<vmem>>, vector<16x32xf32>
    %cst = arith.constant dense<0x7F800000> : vector<16xf32>
    %1 = vector.multi_reduction <minimumf>, %0, %cst [1] : vector<16x32xf32> to vector<16xf32>
    %2 = vector.shape_cast %1 : vector<16xf32> to vector<16x1xf32>
    %cst_1 = arith.constant dense<0.000000e+00> : vector<16xf32>
    %3 = vector.multi_reduction <add>, %0, %cst_1 [1] : vector<16x32xf32> to vector<16xf32>
    %4 = vector.shape_cast %3 : vector<16xf32> to vector<16x1xf32>
    %5 = arith.mulf %0, %0 : vector<16x32xf32>
    %cst_2 = arith.constant dense<0.000000e+00> : vector<16xf32>
    %6 = vector.multi_reduction <add>, %5, %cst_2 [1] : vector<16x32xf32> to vector<16xf32>
    %7 = vector.shape_cast %6 : vector<16xf32> to vector<16x1xf32>
    %cst_3 = arith.constant 3.125000e-02 : f32
    %8 = vector.broadcast %cst_3 : f32 to vector<16x1xf32>
    %9 = arith.mulf %4, %8 : vector<16x1xf32>
    %10 = arith.mulf %9, %9 : vector<16x1xf32>
    %cst_4 = arith.constant 3.200000e+01 : f32
    %11 = vector.broadcast %cst_4 : f32 to vector<16x1xf32>
    %12 = arith.mulf %11, %10 : vector<16x1xf32>
    %13 = arith.subf %7, %12 : vector<16x1xf32>
    %cst_5 = arith.constant 3.100000e+01 : f32
    %14 = vector.broadcast %cst_5 : f32 to vector<16x1xf32>
    %15 = arith.divf %13, %14 : vector<16x1xf32>
    %cst_6 = arith.constant 0.000000e+00 : f32
    %16 = vector.broadcast %cst_6 : f32 to vector<16x1xf32>
    %17 = arith.maximumf %15, %16 : vector<16x1xf32>
    %18 = math.sqrt %17 : vector<16x1xf32>
    %cst_7 = arith.constant 9.99999997E-7 : f32
    %19 = vector.broadcast %cst_7 : f32 to vector<16x1xf32>
    %20 = arith.addf %18, %19 : vector<16x1xf32>
    %21 = tpu.reciprocal %20 {approx = true} : vector<16x1xf32> -> vector<16x1xf32>
    %22 = arith.mulf %20, %21 : vector<16x1xf32>
    %cst_8 = arith.constant 2.000000e+00 : f32
    %23 = vector.broadcast %cst_8 : f32 to vector<16x1xf32>
    %24 = arith.subf %23, %22 : vector<16x1xf32>
    %25 = arith.mulf %21, %24 : vector<16x1xf32>
    %26 = vector.broadcast %2 : vector<16x1xf32> to vector<16x32xf32>
    %27 = arith.subf %0, %26 : vector<16x32xf32>
    %28 = vector.broadcast %25 : vector<16x1xf32> to vector<16x32xf32>
    %29 = arith.mulf %27, %28 : vector<16x32xf32>
    %c0_9 = arith.constant 0 : index
    %c0_10 = arith.constant 0 : index
    %30 = vector.load %arg2[%c0_9, %c0_10] : memref<1x32xf32, #tpu.memory_space<vmem>>, vector<1x32xf32>
    %31 = vector.broadcast %30 : vector<1x32xf32> to vector<16x32xf32>
    %32 = arith.mulf %31, %29 : vector<16x32xf32>
    %c0_11 = arith.constant 0 : index
    %c0_12 = arith.constant 0 : index
    %33 = vector.load %arg3[%c0_11, %c0_12] : memref<1x32xf32, #tpu.memory_space<vmem>>, vector<1x32xf32>
    %34 = vector.broadcast %33 : vector<1x32xf32> to vector<16x32xf32>
    %35 = arith.addf %32, %34 : vector<16x32xf32>
    %c0_13 = arith.constant 0 : index
    %c0_14 = arith.constant 0 : index
    %36 = vector.load %arg4[%c0_13, %c0_14] : memref<16x32xf32, #tpu.memory_space<vmem>>, vector<16x32xf32>
    tpu.vector_store %arg4[%c0_13, %c0_14], %35 {strides = array<i32>} : memref<16x32xf32, #tpu.memory_space<vmem>>, vector<16x32xf32>,
    return
  }
  func.func @transform_0(%arg0: i32) -> (i32, i32) {
    %c0_i32 = arith.constant 0 : i32
    %c0_i32_0 = arith.constant 0 : i32
    return %arg0, %c0_i32 : i32, i32
  }
  func.func @transform_1(%arg0: i32) -> (i32, i32) {
    %c0_i32 = arith.constant 0 : i32
    %c0_i32_0 = arith.constant 0 : i32
    %c0_i32_1 = arith.constant 0 : i32
    return %c0_i32, %c0_i32_0 : i32, i32
  }
  func.func @transform_2(%arg0: i32) -> (i32, i32) {
    %c0_i32 = arith.constant 0 : i32
    %c0_i32_0 = arith.constant 0 : i32
    %c0_i32_1 = arith.constant 0 : i32
    return %c0_i32, %c0_i32_0 : i32, i32
  }
  func.func @transform_3(%arg0: i32) -> (i32, i32) {
    %c0_i32 = arith.constant 0 : i32
    %c0_i32_0 = arith.constant 0 : i32
    return %arg0, %c0_i32 : i32, i32
  }
}

</mosaic_0001>

<bundles_post_ra>
// kernel: tpu_custom_call.1
= control target key start
LH: loop header
LB: loop body
LE: loop exit
PB: predicated region body
PF: predicated region fallthrough
CT: control target
= control target key end

     0   :  { %8 = vsyncpa [#allocation3], 0  ;;  %s274_s0 = inlined_call_operand.hbm [shape: f32[16,32], index: 0, kind: input, shape index: {}]   ;;  %s275_s1 = inlined_call_operand.vmem [shape: f32[1,32], index: 1, kind: input, shape index: {}]   ;;  %s276_s2 = inlined_call_operand.vmem [shape: f32[1,32], index: 2, kind: input, shape index: {}]   ;;  %s277_s3 = inlined_call_operand.hbm [shape: f32[16,32], index: 3, kind: output, shape index: {}]  }
   0x1   :  { %9 = vsyncpa [#allocation4], 0  ;;  %s192_s12 = smov [#allocation2]   ;;  %s144_s16 = scalar_lea.hbm %s274_s0, 256 }
   0x2   :  { %s15_s13 = sshll.u32 %s192_s12, 4  ;;  %p145_p0 = scmp.ne.s32.totalorder %s274_s0, %s144_s16  ;;  %s16_s13 = int_to_ptr.vmem [resolvable:$true] %s15_s13 }
   0x3   :  { %p148_p1 = scmp.lt.u32.totalorder %s144_s16, %s274_s0 }
   0x5   :  { %p150_p2 = pnand %p148_p1, %p145_p0 }
   0x7   :  { %153 = shalt.err (!%p150_p2)
}
   0x8   :  { %s154_s21 = scalar_lea.vmem %s16_s13, 256  ;;  %p159_p4 = scmp.lt.s32.totalorder %s16_s13, %s16_s13 }
   0x9   :  { %p155_p3 = scmp.ne.s32.totalorder %s16_s13, %s154_s21  ;;  %p160_p5 = scmp.lt.s32.totalorder %s154_s21, %s154_s21 }
   0xb   :  { %p161_p6 = por %p160_p5, %p159_p4 }
   0xd   :  { %p162_p7 = pnand %p161_p6, %p155_p3 }
   0xf   :  { %165 = shalt.err (!%p162_p7)
}
  0x10   :  { %s193_s22 = smov 128   ;;  %s194_s23 = smov 8  }
  0x11   :  { %21 = dma.hbm_to_vmem [thread:$0]  %s274_s0, 256, %s16_s13, [#allocation3], %s193_s22, %s193_s22, %s194_s23  }
  0x12   :  { %188 = dma.done.wait [#allocation3], 256  }
  0x13   :  { %189 = vsyncadd [#allocation3], 4294967040  ;;  %vm31_vm0 = vcmask 261120   ;;  %v231_v0 = vld [vmem:[#allocation2] sm:$0xff]  ;;  %v233_v1 = vld [vmem:[#allocation2 + $0x8] sm:$0xff]  ;;  %s195_s29 = smov [#allocation5]  }
  0x14   :  { %v38_v2 = vsel %vm31_vm0, %v231_v0, 0.0  ;;  %v44_v3 = vmul.f32 %v231_v0, %v231_v0  ;;  %v45_v4 = vmul.f32 %v233_v1, %v233_v1  ;;  %v41_v5 = vsel %vm31_vm0, %v233_v1, 0.0  ;;  %v130_v47 = vld [vmem:[%s275_s1] ss:$0 sm:$0xff]  ;;  %s118_s30 = sshll.u32 %s195_s29, 4  ;;  %s119_s30 = int_to_ptr.vmem [resolvable:$true] %s118_s30 }
  0x15   :  { %39 = vadd.xlane.f32.xlu0 %v38_v2  ;;  %v32_v8 = vsel %vm31_vm0, %v231_v0, inf  ;;  %v35_v9 = vsel %vm31_vm0, %v233_v1, inf  ;;  %v131_v51 = vld [vmem:[%s276_s2] ss:$0 sm:$0xff]  ;;  %s166_s1 = scalar_lea.vmem %s119_s30, 256  ;;  %p171_p9 = scmp.lt.s32.totalorder %s119_s30, %s119_s30 }
  0x16   :  { %v46_v6 = vsel %vm31_vm0, %v44_v3, 0.0  ;;  %v49_v7 = vsel %vm31_vm0, %v45_v4, 0.0  ;;  %p167_p8 = scmp.ne.s32.totalorder %s119_s30, %s166_s1  ;;  %p172_p10 = scmp.lt.s32.totalorder %s166_s1, %s166_s1 }
  0x17   :  { %47 = vadd.xlane.f32.xlu1 %v46_v6 }
  0x18   :  { %p173_p11 = por %p172_p10, %p171_p9 }
  0x19   :  { %42 = vadd.xlane.f32.xlu0 %v41_v5 }
  0x1a   :  { %p174_p12 = pnand %p173_p11, %p167_p8 }
  0x1b   :  { %50 = vadd.xlane.f32.xlu1 %v49_v7 }
  0x1d   :  { %33 = vmin.xlane.f32.xlu0 %v32_v8 }
  0x1f   :  { %36 = vmin.xlane.f32.xlu1 %v35_v9 }
  0xa2   :  { %v40_v10 = vpop.xlane.xlu0 %39 }
  0xa3   :  { %v52_v11 = vmul.f32 0.03125, %v40_v10 }
  0xa4   :  { %v48_v12 = vpop.xlane.xlu1 %47 }
  0xa5   :  { %v54_v13 = vmul.f32 %v52_v11, %v52_v11 }
  0xa6   :  { %v43_v14 = vpop.xlane.xlu0 %42 }
  0xa7   :  { %v56_v15 = vmul.f32 32.0, %v54_v13  ;;  %v53_v16 = vmul.f32 0.03125, %v43_v14 }
  0xa8   :  { %v51_v19 = vpop.xlane.xlu1 %50 }
  0xa9   :  { %v55_v17 = vmul.f32 %v53_v16, %v53_v16  ;;  %v58_v18 = vsub.f32 %v48_v12, %v56_v15 }
  0xaa   :  { %v34_v39 = vpop.xlane.xlu0 %33 }
  0xab   :  { %v57_v20 = vmul.f32 32.0, %v55_v17  ;;  %v61_v21 = vmul.f32 0.032258064, %v58_v18  ;;  %v89_v42 = vsub.f32 %v231_v0, %v34_v39 }
  0xac   :  { %v37_v44 = vpop.xlane.xlu1 %36 }
  0xad   :  { %v63_v22 = vmax.f32 %v61_v21, 0.0  ;;  %v59_v23 = vsub.f32 %v51_v19, %v57_v20  ;;  %v90_v50 = vsub.f32 %v233_v1, %v37_v44 }
  0xaf   :  { %136 = vrsqrt.f32 %v63_v22  ;;  %v62_v24 = vmul.f32 0.032258064, %v59_v23  ;;  %vm67_vm1 = vcmp.eq.f32.partialorder %v63_v22, inf  ;;  %v70_v28 = vand.u32 2147483648, %v63_v22 }
  0xb0   :  { %vm69_vm2 = vcmp.eq.f32.partialorder %v63_v22, 0.0 }
  0xb1   :  { %v64_v25 = vmax.f32 %v62_v24, 0.0 }
  0xb3   :  { %138 = vrsqrt.f32 %v64_v25  ;;  %vm74_vm3 = vcmp.eq.f32.partialorder %v64_v25, inf  ;;  %v77_v34 = vand.u32 2147483648, %v64_v25  ;;  %vm76_vm4 = vcmp.eq.f32.partialorder %v64_v25, 0.0 }
  0xb9   :  { %v137_v26 = vpop.eup %136 }
  0xba   :  { %v66_v27 = vmul.f32 %v137_v26, %v63_v22 }
  0xbc   :  { %v68_v29 = vsel %vm67_vm1, %v63_v22, %v66_v27 }
  0xbd   :  { %v139_v30 = vpop.eup %138  ;;  %v71_v31 = vsel %vm69_vm2, %v70_v28, %v68_v29 }
  0xbe   :  { %v79_v32 = vadd.f32 1e-06, %v71_v31  ;;  %v73_v33 = vmul.f32 %v139_v30, %v64_v25 }
  0xc0   :  { %140 = vrcp.f32 %v79_v32  ;;  %v75_v35 = vsel %vm74_vm3, %v64_v25, %v73_v33 }
  0xc1   :  { %v78_v36 = vsel %vm76_vm4, %v77_v34, %v75_v35 }
  0xc2   :  { %v80_v37 = vadd.f32 1e-06, %v78_v36 }
  0xc4   :  { %142 = vrcp.f32 %v80_v37 }
  0xca   :  { %v141_v38 = vpop.eup %140 }
  0xcb   :  { %v83_v40 = vmul.f32 %v141_v38, %v79_v32 }
  0xcd   :  { %v85_v41 = vsub.f32 2.0, %v83_v40 }
  0xce   :  { %v143_v43 = vpop.eup %142 }
  0xcf   :  { %v87_v45 = vmul.f32 %v141_v38, %v85_v41  ;;  %v84_v46 = vmul.f32 %v143_v43, %v80_v37 }
  0xd1   :  { %v91_v48 = vmul.f32 %v89_v42, %v87_v45  ;;  %v86_v49 = vsub.f32 2.0, %v84_v46 }
  0xd3   :  { %v100_v52 = vmul.f32 %v130_v47, %v91_v48  ;;  %v88_v53 = vmul.f32 %v143_v43, %v86_v49 }
  0xd5   :  { %v109_v54 = vadd.f32 %v131_v51, %v100_v52  ;;  %v92_v55 = vmul.f32 %v90_v50, %v88_v53 }
  0xd7   :  { %111 = vst.msk [vmem:[#allocation5] sm:$0xff] %vm31_vm0, %v109_v54  ;;  %v101_v56 = vmul.f32 %v130_v47, %v92_v55 }
  0xd9   :  { %v110_v57 = vadd.f32 %v131_v51, %v101_v56 }
  0xdb   :  { %112 = vst.msk [vmem:[#allocation5 + $0x8] sm:$0xff] %vm31_vm0, %v110_v57 }
  0xdc   :  { %177 = shalt.err (!%p174_p12)
}
  0xdd   :  { %s178_s5 = scalar_lea.hbm %s277_s3, 256 }
  0xde   :  { %p179_p13 = scmp.ne.s32.totalorder %s277_s3, %s178_s5  ;;  %p182_p0 = scmp.lt.u32.totalorder %s178_s5, %s277_s3 }
  0xe0   :  { %p184_p1 = pnand %p182_p0, %p179_p13 }
  0xe2   :  { %187 = shalt.err (!%p184_p1)
}
  0xe3   :  { %124 = dma.vmem_to_hbm [thread:$0]  %s119_s30, 256, %s277_s3, [#allocation4], %s193_s22, %s193_s22, %s194_s23  }
  0xe4   :  { %190 = dma.done.wait [#allocation4], 256  }
  0xe5   :  { %191 = vsyncadd [#allocation4], 4294967040 }
  0xe6   :  { %128 = vsyncpa [#allocation3], 1 }
  0xe7   :  { %129 = vsyncpa [#allocation4], 1 }

</bundles_post_ra>
